<compile_context>
chip_gen: v7x
topology: tpu7x:2x2x1
jax: 0.10.0
libtpu: 0.0.40
codegen_flags: <defaults>
</compile_context>

<pallas_src>
import jax
import jax.numpy as jnp
from jax.experimental import pallas as pl
from jax.experimental.pallas import tpu as pltpu


def _round_up(x, m):
    return (x + m - 1) // m * m


def encoder_kernel(x_ref, w1_ref, b1_ref, wh_ref, bh_ref, eps_ref, out_ref):
    zdim = eps_ref.shape[-1]
    # fc1 + ReLU: bf16 operands, f32 MXU accumulation, f32 epilogue.
    h1 = jnp.dot(x_ref[...], w1_ref[...], preferred_element_type=jnp.float32)
    h1 = jnp.maximum(h1 + b1_ref[...], 0.0)                          # [TB, Hid] f32

    # Fused head (fc21 | fc22): single [Hid, 2*Z] matmul.
    y = jnp.dot(h1.astype(wh_ref.dtype), wh_ref[...],
                preferred_element_type=jnp.float32) + bh_ref[...]    # [TB, 2*Z] f32
    mu = y[:, :zdim]
    logvar = y[:, zdim:]

    # Reparameterize: z = mu + eps * exp(0.5 * logvar)
    z = mu + eps_ref[...] * jnp.exp(0.5 * logvar)

    # Single packed, lane-contiguous output slab [z | mu | logvar] -> one store/DMA.
    out_ref[...] = jnp.concatenate([z, mu, logvar], axis=-1)


def encoder_forward(x, params, eps, *, max_tile_b=256):
    """x: [B, C, W, H] or [B, W, H]; returns (z, mu, logvar) — stochastic path."""
    if x.ndim == 4:
        D = x.shape[1] * x.shape[2] * x.shape[3]
    elif x.ndim == 3:
        D = x.shape[1] * x.shape[2]
    else:
        raise ValueError("expected 3-D or 4-D input")
    x_flat = x.reshape(-1, D)                        # same as torch .view(-1, D)
    B = x_flat.shape[0]

    # bf16 weight storage (halves weight DMA bytes; MXU-native); f32 biases.
    w1 = params["w1"].astype(jnp.bfloat16)                                   # [D, Hid]
    b1 = params["b1"].astype(jnp.float32)                                    # [1, Hid]
    w_head = jnp.concatenate([params["w21"], params["w22"]],
                             axis=1).astype(jnp.bfloat16)                    # [Hid, 2Z]
    b_head = jnp.concatenate([params["b21"], params["b22"]],
                             axis=1).astype(jnp.float32)                     # [1, 2Z]
    Hid = w1.shape[1]
    Z = params["w21"].shape[1]

    # Batch tile: multiple of 8 sublanes, as large as sensible; pad B to a tile.
    tile_b = min(max_tile_b, _round_up(B, 8))
    b_pad = _round_up(B, tile_b)
    n_b = b_pad // tile_b

    x_bf = x_flat.astype(jnp.bfloat16)
    eps_f = eps.astype(jnp.float32)
    if b_pad != B:
        x_bf = jnp.pad(x_bf, ((0, b_pad - B), (0, 0)))
        eps_f = jnp.pad(eps_f, ((0, b_pad - B), (0, 0)))

    resident = lambda shape: pl.BlockSpec(shape, lambda i: (0, 0))

    # TODO(synk): for very large D*Hid (w1 tile > ~40 MiB on v7x) add a K-reduction
    # grid axis with an f32 accumulator scratch; not needed at these sizes.
    packed = pl.pallas_call(
        encoder_kernel,
        out_shape=jax.ShapeDtypeStruct((b_pad, 3 * Z), jnp.float32),
        grid=(n_b,),
        in_specs=[
            pl.BlockSpec((tile_b, D), lambda i: (i, 0)),   # x tile (pipelined)
            resident((D, Hid)),                            # w1   (resident)
            resident((1, Hid)),                            # b1   (resident)
            resident((Hid, 2 * Z)),                        # fused head weight
            resident((1, 2 * Z)),                          # fused head bias
            pl.BlockSpec((tile_b, Z), lambda i: (i, 0)),   # eps tile
        ],
        out_specs=pl.BlockSpec((tile_b, 3 * Z), lambda i: (i, 0)),
        compiler_params=pltpu.CompilerParams(
            dimension_semantics=("parallel",)),
    )(x_bf, w1, b1, w_head, b_head, eps_f)

    z = packed[:B, :Z]
    mu = packed[:B, Z:2 * Z]
    logvar = packed[:B, 2 * Z:]
    return z, mu, logvar


def init_params(key, input_dim, hidden, z_dim):
    """Deterministic synthetic init (Linear weights stored as [in, out])."""
    k1, k2, k3, k4, k5, k6 = jax.random.split(key, 6)
    s1 = 1.0 / jnp.sqrt(input_dim)
    s2 = 1.0 / jnp.sqrt(hidden)
    return {
        "w1":  jax.random.uniform(k1, (input_dim, hidden), jnp.float32, -s1, s1),
        "b1":  jax.random.uniform(k2, (1, hidden), jnp.float32, -s1, s1),
        "w21": jax.random.uniform(k3, (hidden, z_dim), jnp.float32, -s2, s2),
        "b21": jax.random.uniform(k4, (1, z_dim), jnp.float32, -s2, s2),
        "w22": jax.random.uniform(k5, (hidden, z_dim), jnp.float32, -s2, s2),
        "b22": jax.random.uniform(k6, (1, z_dim), jnp.float32, -s2, s2),
    }


if __name__ == "__main__":
    # Small synthetic config: batch=2, channels=4, spatial=16x16 -> input_dim=1024
    B, C, W, H = 2, 4, 16, 16
    D = C * W * H
    HIDDEN = 32
    Z_DIM = 8

    key = jax.random.PRNGKey(0)
    kx, kp, ke = jax.random.split(key, 3)

    x = jax.random.normal(kx, (B, C, W, H), dtype=jnp.float32)
    params = init_params(kp, D, HIDDEN, Z_DIM)
    eps = jax.random.normal(ke, (B, Z_DIM), dtype=jnp.float32)   # randn_like(std)

    z, mu, logvar = encoder_forward(x, params, eps)
    jax.block_until_ready((z, mu, logvar))

    # Reference in plain JAX, mirroring the kernel's bf16 weight/activation storage
    # (bf16 values are exact in f32, so only accumulation order differs).
    xf = x.reshape(-1, D)
    xb = xf.astype(jnp.bfloat16).astype(jnp.float32)
    w1b = params["w1"].astype(jnp.bfloat16).astype(jnp.float32)
    w21b = params["w21"].astype(jnp.bfloat16).astype(jnp.float32)
    w22b = params["w22"].astype(jnp.bfloat16).astype(jnp.float32)
    h1_ref = jnp.maximum(xb @ w1b + params["b1"], 0.0)
    h1b = h1_ref.astype(jnp.bfloat16).astype(jnp.float32)
    mu_ref = h1b @ w21b + params["b21"]
    lv_ref = h1b @ w22b + params["b22"]
    z_ref = mu_ref + eps * jnp.exp(0.5 * lv_ref)

    assert jnp.allclose(mu, mu_ref, atol=2e-3, rtol=2e-3)
    assert jnp.allclose(logvar, lv_ref, atol=2e-3, rtol=2e-3)
    assert jnp.allclose(z, z_ref, atol=2e-3, rtol=2e-3)

    print("KERNEL_OK")
</pallas_src>

<mosaic_0001>
module attributes {stable_mosaic.version = 11 : i64} {
  func.func @encoder_kernel(%arg0: i32, %arg1: memref<8x1024xbf16, #tpu.memory_space<vmem>>, %arg2: memref<1024x32xbf16, #tpu.memory_space<vmem>>, %arg3: memref<1x32xf32, #tpu.memory_space<vmem>>, %arg4: memref<32x16xbf16, #tpu.memory_space<vmem>>, %arg5: memref<1x16xf32, #tpu.memory_space<vmem>>, %arg6: memref<8x8xf32, #tpu.memory_space<vmem>>, %arg7: memref<8x24xf32, #tpu.memory_space<vmem>>) attributes {dimension_semantics = [#tpu.dimension_semantics<parallel>], iteration_bounds = array<i64: 1>, scalar_prefetch = 0 : i64, scratch_operands = 0 : i64, tpu.core_type = #tpu.core_type<tc>, window_params = [{transform_indices = @transform_0, window_bounds = array<i64: 8, 1024>}, {pipeline_mode = #tpu.pipeline_mode<synchronous>, transform_indices = @transform_1, window_bounds = array<i64: 1024, 32>}, {pipeline_mode = #tpu.pipeline_mode<synchronous>, transform_indices = @transform_2, window_bounds = array<i64: 1, 32>}, {pipeline_mode = #tpu.pipeline_mode<synchronous>, transform_indices = @transform_3, window_bounds = array<i64: 32, 16>}, {pipeline_mode = #tpu.pipeline_mode<synchronous>, transform_indices = @transform_4, window_bounds = array<i64: 1, 16>}, {transform_indices = @transform_5, window_bounds = array<i64: 8, 8>}, {transform_indices = @transform_6, window_bounds = array<i64: 8, 24>}]} {
    %c0 = arith.constant 0 : index
    %c0_0 = arith.constant 0 : index
    %0 = vector.load %arg1[%c0, %c0_0] : memref<8x1024xbf16, #tpu.memory_space<vmem>>, vector<8x1024xbf16>
    %c0_1 = arith.constant 0 : index
    %c0_2 = arith.constant 0 : index
    %1 = vector.load %arg2[%c0_1, %c0_2] : memref<1024x32xbf16, #tpu.memory_space<vmem>>, vector<1024x32xbf16>
    %cst = arith.constant dense<0.000000e+00> : vector<8x32xf32>
    %2 = tpu.matmul %0, %1, %cst {dimension_numbers = #tpu.dot_dimension_numbers<[1], [0], [0], [1], [0, 0, 1, 1], [], []>} : vector<8x1024xbf16>, vector<1024x32xbf16>, vector<8x32xf32> -> vector<8x32xf32>
    %c0_3 = arith.constant 0 : index
    %c0_4 = arith.constant 0 : index
    %3 = vector.load %arg3[%c0_3, %c0_4] : memref<1x32xf32, #tpu.memory_space<vmem>>, vector<1x32xf32>
    %4 = vector.broadcast %3 : vector<1x32xf32> to vector<8x32xf32>
    %5 = arith.addf %2, %4 : vector<8x32xf32>
    %cst_5 = arith.constant 0.000000e+00 : f32
    %6 = vector.broadcast %cst_5 : f32 to vector<8x32xf32>
    %7 = arith.maximumf %5, %6 : vector<8x32xf32>
    %8 = arith.truncf %7 : vector<8x32xf32> to vector<8x32xbf16>
    %c0_6 = arith.constant 0 : index
    %c0_7 = arith.constant 0 : index
    %9 = vector.load %arg4[%c0_6, %c0_7] : memref<32x16xbf16, #tpu.memory_space<vmem>>, vector<32x16xbf16>
    %cst_8 = arith.constant dense<0.000000e+00> : vector<8x16xf32>
    %10 = tpu.matmul %8, %9, %cst_8 {dimension_numbers = #tpu.dot_dimension_numbers<[1], [0], [0], [1], [0, 0, 1, 1], [], []>} : vector<8x32xbf16>, vector<32x16xbf16>, vector<8x16xf32> -> vector<8x16xf32>
    %c0_9 = arith.constant 0 : index
    %c0_10 = arith.constant 0 : index
    %11 = vector.load %arg5[%c0_9, %c0_10] : memref<1x16xf32, #tpu.memory_space<vmem>>, vector<1x16xf32>
    %12 = vector.broadcast %11 : vector<1x16xf32> to vector<8x16xf32>
    %13 = arith.addf %10, %12 : vector<8x16xf32>
    %14 = vector.extract_strided_slice %13 {offsets = [0, 0], sizes = [8, 8], strides = [1, 1]} : vector<8x16xf32> to vector<8x8xf32>
    %15 = vector.extract_strided_slice %13 {offsets = [0, 8], sizes = [8, 8], strides = [1, 1]} : vector<8x16xf32> to vector<8x8xf32>
    %c0_11 = arith.constant 0 : index
    %c0_12 = arith.constant 0 : index
    %16 = vector.load %arg6[%c0_11, %c0_12] : memref<8x8xf32, #tpu.memory_space<vmem>>, vector<8x8xf32>
    %cst_13 = arith.constant 5.000000e-01 : f32
    %17 = vector.broadcast %cst_13 : f32 to vector<8x8xf32>
    %18 = arith.mulf %17, %15 : vector<8x8xf32>
    %19 = math.exp %18 : vector<8x8xf32>
    %20 = arith.mulf %16, %19 : vector<8x8xf32>
    %21 = arith.addf %14, %20 : vector<8x8xf32>
    %22 = tpu.concatenate %21, %14, %15 in 1 : vector<8x8xf32>, vector<8x8xf32>, vector<8x8xf32> -> vector<8x24xf32>
    %c0_14 = arith.constant 0 : index
    %c0_15 = arith.constant 0 : index
    %23 = vector.load %arg7[%c0_14, %c0_15] : memref<8x24xf32, #tpu.memory_space<vmem>>, vector<8x24xf32>
    tpu.vector_store %arg7[%c0_14, %c0_15], %22 {strides = array<i32>} : memref<8x24xf32, #tpu.memory_space<vmem>>, vector<8x24xf32>,
    return
  }
  func.func @transform_0(%arg0: i32) -> (i32, i32) {
    %c0_i32 = arith.constant 0 : i32
    %c0_i32_0 = arith.constant 0 : i32
    return %arg0, %c0_i32 : i32, i32
  }
  func.func @transform_1(%arg0: i32) -> (i32, i32) {
    %c0_i32 = arith.constant 0 : i32
    %c0_i32_0 = arith.constant 0 : i32
    %c0_i32_1 = arith.constant 0 : i32
    return %c0_i32, %c0_i32_0 : i32, i32
  }
  func.func @transform_2(%arg0: i32) -> (i32, i32) {
    %c0_i32 = arith.constant 0 : i32
    %c0_i32_0 = arith.constant 0 : i32
    %c0_i32_1 = arith.constant 0 : i32
    return %c0_i32, %c0_i32_0 : i32, i32
  }
  func.func @transform_3(%arg0: i32) -> (i32, i32) {
    %c0_i32 = arith.constant 0 : i32
    %c0_i32_0 = arith.constant 0 : i32
    %c0_i32_1 = arith.constant 0 : i32
    return %c0_i32, %c0_i32_0 : i32, i32
  }
  func.func @transform_4(%arg0: i32) -> (i32, i32) {
    %c0_i32 = arith.constant 0 : i32
    %c0_i32_0 = arith.constant 0 : i32
    %c0_i32_1 = arith.constant 0 : i32
    return %c0_i32, %c0_i32_0 : i32, i32
  }
  func.func @transform_5(%arg0: i32) -> (i32, i32) {
    %c0_i32 = arith.constant 0 : i32
    %c0_i32_0 = arith.constant 0 : i32
    return %arg0, %c0_i32 : i32, i32
  }
  func.func @transform_6(%arg0: i32) -> (i32, i32) {
    %c0_i32 = arith.constant 0 : i32
    %c0_i32_0 = arith.constant 0 : i32
    return %arg0, %c0_i32 : i32, i32
  }
}

</mosaic_0001>

<bundles_post_ra>
// kernel: tpu_custom_call.1
= control target key start
LH: loop header
LB: loop body
LE: loop exit
PB: predicated region body
PF: predicated region fallthrough
CT: control target
= control target key end

     0   :  { %s1391_s0 = inlined_call_operand.vmem [shape: bf16[8,1024], index: 0, kind: input, shape index: {}]   ;;  %s1392_s1 = inlined_call_operand.vmem [shape: bf16[1024,32], index: 1, kind: input, shape index: {}]   ;;  %s1393_s2 = inlined_call_operand.vmem [shape: f32[1,32], index: 2, kind: input, shape index: {}]   ;;  %s1394_s3 = inlined_call_operand.vmem [shape: bf16[32,16], index: 3, kind: input, shape index: {}]   ;;  %s1395_s4 = inlined_call_operand.vmem [shape: f32[1,16], index: 4, kind: input, shape index: {}]   ;;  %s1396_s5 = inlined_call_operand.vmem [shape: f32[8,8], index: 5, kind: input, shape index: {}]   ;;  %s1397_s6 = inlined_call_operand.hbm [shape: f32[8,24], index: 6, kind: output, shape index: {}]  }
   0x1   :  { %v1020_v0 = vld [vmem:[%s1392_s1 + $0x40] sm:$0xff]   ;;  %v1024_v4 = vld [vmem:[%s1392_s1 + $0x48] sm:$0xff]   ;;  %v1028_v8 = vld [vmem:[%s1392_s1 + $0x50] sm:$0xff]  }
   0x2   :  { %v1021_v1 = vld [vmem:[%s1392_s1 + $0xc0] sm:$0xff]   ;;  %916 = vmatprep.subr.bf16.mxu0 %v1020_v0  ;;  %v1025_v5 = vld [vmem:[%s1392_s1 + $0xc8] sm:$0xff]   ;;  %v1029_v9 = vld [vmem:[%s1392_s1 + $0xd0] sm:$0xff]  }
   0x3   :  { %v1022_v2 = vld [vmem:[%s1392_s1] sm:$0xff]   ;;  %938 = vmatprep.subr.bf16.mxu1 %v1021_v1  ;;  %v1026_v6 = vld [vmem:[%s1392_s1 + $0x8] sm:$0xff]   ;;  %v1030_v10 = vld [vmem:[%s1392_s1 + $0x10] sm:$0xff]  }
   0x4   :  { %v1023_v3 = vld [vmem:[%s1392_s1 + $0x80] sm:$0xff]   ;;  %917 = vmatpush3.bf16.msra.mxu0 %v1022_v2  ;;  %v1027_v7 = vld [vmem:[%s1392_s1 + $0x88] sm:$0xff]   ;;  %v1031_v11 = vld [vmem:[%s1392_s1 + $0x90] sm:$0xff]  }
   0x5   :  { %939 = vmatpush3.bf16.msra.mxu1 %v1023_v3  ;;  %918 = vmatprep.subr.bf16.mxu0 %v1024_v4  ;;  %v1032_v12 = vld [vmem:[%s1392_s1 + $0x58] sm:$0xff]   ;;  %v1036_v16 = vld [vmem:[%s1392_s1 + $0x60] sm:$0xff]   ;;  %v1040_v20 = vld [vmem:[%s1392_s1 + $0x68] sm:$0xff]  }
   0x6   :  { %940 = vmatprep.subr.bf16.mxu1 %v1025_v5  ;;  %v1033_v13 = vld [vmem:[%s1392_s1 + $0xd8] sm:$0xff]   ;;  %v1037_v17 = vld [vmem:[%s1392_s1 + $0xe0] sm:$0xff]   ;;  %v1041_v21 = vld [vmem:[%s1392_s1 + $0xe8] sm:$0xff]  }
   0x7   :  { %v1034_v14 = vld [vmem:[%s1392_s1 + $0x18] sm:$0xff]   ;;  %v1038_v18 = vld [vmem:[%s1392_s1 + $0x20] sm:$0xff]   ;;  %v1042_v22 = vld [vmem:[%s1392_s1 + $0x28] sm:$0xff]  }
   0x8   :  { %919 = vmatpush3.bf16.msra.mxu0 %v1026_v6  ;;  %v1035_v15 = vld [vmem:[%s1392_s1 + $0x98] sm:$0xff]   ;;  %v1039_v19 = vld [vmem:[%s1392_s1 + $0xa0] sm:$0xff]   ;;  %v1043_v23 = vld [vmem:[%s1392_s1 + $0xa8] sm:$0xff]  }
   0x9   :  { %941 = vmatpush3.bf16.msra.mxu1 %v1027_v7  ;;  %920 = vmatprep.subr.bf16.mxu0 %v1028_v8  ;;  %v1044_v24 = vld [vmem:[%s1392_s1 + $0x70] sm:$0xff]   ;;  %v1048_v28 = vld [vmem:[%s1392_s1 + $0x78] sm:$0xff]   ;;  %v25_v32 = vld [vmem:[%s1391_s0] sm:$0xff] }
   0xa   :  { %942 = vmatprep.subr.bf16.mxu1 %v1029_v9  ;;  %v1045_v25 = vld [vmem:[%s1392_s1 + $0xf0] sm:$0xff]   ;;  %v1049_v29 = vld [vmem:[%s1392_s1 + $0xf8] sm:$0xff]   ;;  %v26_v33 = vld [vmem:[%s1391_s0 + $0x8] sm:$0xff]  ;;  %v840_v34 = vcombine.low %v25_v32, %v25_v32  ;;  %v841_v35 = vcombine.high %v25_v32, %v25_v32 }
   0xb   :  { %v1046_v26 = vld [vmem:[%s1392_s1 + $0x30] sm:$0xff]   ;;  %v1050_v30 = vld [vmem:[%s1392_s1 + $0x38] sm:$0xff]   ;;  %v842_v36 = vcombine.low %v26_v33, %v26_v33  ;;  %v843_v37 = vcombine.high %v26_v33, %v26_v33  ;;  %v1056_v38 = vld [vmem:[%s1392_s1 + $0x140] sm:$0xff]  }
   0xc   :  { %921 = vmatpush3.bf16.msra.mxu0 %v1030_v10  ;;  %v1047_v27 = vld [vmem:[%s1392_s1 + $0xb0] sm:$0xff]   ;;  %v1051_v31 = vld [vmem:[%s1392_s1 + $0xb8] sm:$0xff]   ;;  %v1057_v39 = vld [vmem:[%s1392_s1 + $0x1c0] sm:$0xff]   ;;  %608 = vmatprep.mubr.bf16.mxu0 %v841_v35 }
   0xd   :  { %943 = vmatpush3.bf16.msra.mxu1 %v1031_v11  ;;  %922 = vmatprep.subr.bf16.mxu0 %v1032_v12  ;;  %v1058_v40 = vld [vmem:[%s1392_s1 + $0x100] sm:$0xff]   ;;  %v1060_v42 = vld [vmem:[%s1392_s1 + $0x148] sm:$0xff]   ;;  %v1064_v46 = vld [vmem:[%s1392_s1 + $0x150] sm:$0xff]  }
   0xe   :  { %944 = vmatprep.subr.bf16.mxu1 %v1033_v13  ;;  %648 = vmatprep.mubr.bf16.mxu1 %v843_v37  ;;  %v1059_v41 = vld [vmem:[%s1392_s1 + $0x180] sm:$0xff]   ;;  %v1061_v43 = vld [vmem:[%s1392_s1 + $0x1c8] sm:$0xff]   ;;  %v1065_v47 = vld [vmem:[%s1392_s1 + $0x1d0] sm:$0xff]  }
   0xf   :  { %v1062_v44 = vld [vmem:[%s1392_s1 + $0x108] sm:$0xff]   ;;  %v1066_v48 = vld [vmem:[%s1392_s1 + $0x110] sm:$0xff]   ;;  %v1068_v50 = vld [vmem:[%s1392_s1 + $0x158] sm:$0xff]  }
  0x10   :  { %923 = vmatpush3.bf16.msra.mxu0 %v1034_v14  ;;  %v1063_v45 = vld [vmem:[%s1392_s1 + $0x188] sm:$0xff]   ;;  %v1067_v49 = vld [vmem:[%s1392_s1 + $0x190] sm:$0xff]   ;;  %v1069_v51 = vld [vmem:[%s1392_s1 + $0x1d8] sm:$0xff]  }
  0x11   :  { %945 = vmatpush3.bf16.msra.mxu1 %v1035_v15  ;;  %924 = vmatprep.subr.bf16.mxu0 %v1036_v16  ;;  %v1070_v52 = vld [vmem:[%s1392_s1 + $0x118] sm:$0xff]   ;;  %v1072_v54 = vld [vmem:[%s1392_s1 + $0x160] sm:$0xff]   ;;  %v1076_v58 = vld [vmem:[%s1392_s1 + $0x168] sm:$0xff]  }
  0x12   :  { %946 = vmatprep.subr.bf16.mxu1 %v1037_v17  ;;  %v1071_v53 = vld [vmem:[%s1392_s1 + $0x198] sm:$0xff]   ;;  %v1073_v55 = vld [vmem:[%s1392_s1 + $0x1e0] sm:$0xff]   ;;  %v1077_v59 = vld [vmem:[%s1392_s1 + $0x1e8] sm:$0xff]  }
  0x13   :  { %v1074_v56 = vld [vmem:[%s1392_s1 + $0x120] sm:$0xff]   ;;  %v1078_v60 = vld [vmem:[%s1392_s1 + $0x128] sm:$0xff]   ;;  %v1080_v62 = vld [vmem:[%s1392_s1 + $0x170] sm:$0xff]  }
  0x14   :  { %925 = vmatpush3.bf16.msra.mxu0 %v1038_v18  ;;  %v1075_v57 = vld [vmem:[%s1392_s1 + $0x1a0] sm:$0xff]   ;;  %v1079_v61 = vld [vmem:[%s1392_s1 + $0x1a8] sm:$0xff]   ;;  %v1081_v63 = vld [vmem:[%s1392_s1 + $0x1f0] sm:$0xff]  }
  0x15   :  { %947 = vmatpush3.bf16.msra.mxu1 %v1039_v19  ;;  %926 = vmatprep.subr.bf16.mxu0 %v1040_v20  ;;  %v1082_v0 = vld [vmem:[%s1392_s1 + $0x130] sm:$0xff]   ;;  %v1084_v2 = vld [vmem:[%s1392_s1 + $0x178] sm:$0xff]  }
  0x16   :  { %948 = vmatprep.subr.bf16.mxu1 %v1041_v21  ;;  %v1083_v1 = vld [vmem:[%s1392_s1 + $0x1b0] sm:$0xff]   ;;  %v1085_v3 = vld [vmem:[%s1392_s1 + $0x1f8] sm:$0xff]  }
  0x17   :  { %v1086_v4 = vld [vmem:[%s1392_s1 + $0x138] sm:$0xff]   ;;  %v27_v6 = vld [vmem:[%s1391_s0 + $0x10] sm:$0xff] }
  0x18   :  { %927 = vmatpush3.bf16.msra.mxu0 %v1042_v22  ;;  %v1087_v5 = vld [vmem:[%s1392_s1 + $0x1b8] sm:$0xff]   ;;  %v844_v7 = vcombine.low %v27_v6, %v27_v6  ;;  %v845_v8 = vcombine.high %v27_v6, %v27_v6 }
  0x19   :  { %949 = vmatpush3.bf16.msra.mxu1 %v1043_v23  ;;  %928 = vmatprep.subr.bf16.mxu0 %v1044_v24  ;;  %v28_v9 = vld [vmem:[%s1391_s0 + $0x18] sm:$0xff] }
  0x1a   :  { %950 = vmatprep.subr.bf16.mxu1 %v1045_v25  ;;  %v846_v10 = vcombine.low %v28_v9, %v28_v9  ;;  %v847_v11 = vcombine.high %v28_v9, %v28_v9 }
  0x1c   :  { %929 = vmatpush3.bf16.msra.mxu0 %v1046_v26 }
  0x1d   :  { %951 = vmatpush3.bf16.msra.mxu1 %v1047_v27  ;;  %930 = vmatprep.subr.bf16.mxu0 %v1048_v28 }
  0x1e   :  { %952 = vmatprep.subr.bf16.mxu1 %v1049_v29 }
  0x20   :  { %931 = vmatpush3.bf16.msra.mxu0 %v1050_v30 }
  0x21   :  { %953 = vmatpush3.bf16.msra.mxu1 %v1051_v31  ;;  %960 = vmatprep.subr.bf16.mxu0 %v1056_v38 }
  0x22   :  { %982 = vmatprep.subr.bf16.mxu1 %v1057_v39 }
  0x23   :  { %609 = vmatmul.mubr.bf16.vlgmr.msra.gmra.mrb[0].mxu0 %v840_v34 }
  0x24   :  { %649 = vmatmul.mubr.bf16.vlgmr.msra.gmra.mrb[0].mxu1 %v842_v36  ;;  %961 = vmatpush3.bf16.msra.mxu0 %v1058_v40 }
  0x25   :  { %983 = vmatpush3.bf16.msra.mxu1 %v1059_v41  ;;  %962 = vmatprep.subr.bf16.mxu0 %v1060_v42 }
  0x26   :  { %984 = vmatprep.subr.bf16.mxu1 %v1061_v43 }
  0x28   :  { %963 = vmatpush3.bf16.msra.mxu0 %v1062_v44 }
  0x29   :  { %985 = vmatpush3.bf16.msra.mxu1 %v1063_v45  ;;  %964 = vmatprep.subr.bf16.mxu0 %v1064_v46 }
  0x2a   :  { %986 = vmatprep.subr.bf16.mxu1 %v1065_v47 }
  0x2c   :  { %965 = vmatpush3.bf16.msra.mxu0 %v1066_v48 }
  0x2d   :  { %987 = vmatpush3.bf16.msra.mxu1 %v1067_v49  ;;  %966 = vmatprep.subr.bf16.mxu0 %v1068_v50 }
  0x2e   :  { %988 = vmatprep.subr.bf16.mxu1 %v1069_v51 }
  0x30   :  { %967 = vmatpush3.bf16.msra.mxu0 %v1070_v52 }
  0x31   :  { %989 = vmatpush3.bf16.msra.mxu1 %v1071_v53  ;;  %968 = vmatprep.subr.bf16.mxu0 %v1072_v54 }
  0x32   :  { %990 = vmatprep.subr.bf16.mxu1 %v1073_v55 }
  0x34   :  { %969 = vmatpush3.bf16.msra.mxu0 %v1074_v56 }
  0x35   :  { %991 = vmatpush3.bf16.msra.mxu1 %v1075_v57  ;;  %970 = vmatprep.subr.bf16.mxu0 %v1076_v58 }
  0x36   :  { %992 = vmatprep.subr.bf16.mxu1 %v1077_v59 }
  0x38   :  { %971 = vmatpush3.bf16.msra.mxu0 %v1078_v60 }
  0x39   :  { %993 = vmatpush3.bf16.msra.mxu1 %v1079_v61  ;;  %972 = vmatprep.subr.bf16.mxu0 %v1080_v62 }
  0x3a   :  { %994 = vmatprep.subr.bf16.mxu1 %v1081_v63 }
  0x3c   :  { %973 = vmatpush3.bf16.msra.mxu0 %v1082_v0 }
  0x3d   :  { %995 = vmatpush3.bf16.msra.mxu1 %v1083_v1  ;;  %974 = vmatprep.subr.bf16.mxu0 %v1084_v2 }
  0x3e   :  { %996 = vmatprep.subr.bf16.mxu1 %v1085_v3 }
  0x40   :  { %975 = vmatpush3.bf16.msra.mxu0 %v1086_v4 }
  0x41   :  { %997 = vmatpush3.bf16.msra.mxu1 %v1087_v5 }
  0x42   :  { %11 = vsyncpa [#allocation3], 0  ;;  %688 = vmatprep.mubr.bf16.mxu0 %v845_v8  ;;  %728 = vmatprep.mubr.bf16.mxu1 %v847_v11  ;;  %v1092_v12 = vld [vmem:[%s1394_s3] sm:$0xff]   ;;  %v1120_v13 = vmov 0.0   ;;  %v1093_v14 = vld [vmem:[%s1394_s3 + $0x8] sm:$0xff]   ;;  %vm1121_vm0 = vmmov 0  }
  0x43   :  { %689 = vmatmul.mubr.bf16.vlgmr.msra.gmra.mrb[4].mxu0 %v844_v7  ;;  %1007 = vmatprep.subr.bf16.mxu0 %v1120_v13  ;;  %v839_v17 = vld [vmem:[%s1393_s2] ss:$0 sm:$0xff]  ;;  %vm761_vm1 = vcmask 261120   ;;  %s1122_s17 = smov 120   ;;  %s1123_s18 = smov 8   ;;  %vm819_vm2 = vcmask 64512  }
  0x44   :  { %729 = vmatmul.mubr.bf16.vlgmr.msra.gmra.mrb[4].mxu1 %v846_v10  ;;  %1008 = vmatpush3.bf16.msra.mxu0 %v1092_v12  ;;  %v912_v42 = vld [vmem:[%s1395_s4] ss:$0 sm:$0xff]  ;;  %s1124_s4 = smov [#allocation2]   ;;  %vm821_vm3 = vcmask 130048   ;;  %vm823_vm4 = vcmask 195584  }
  0x45   :  { %1009 = vmatprep.subr.bf16.mxu0 %v1120_v13  ;;  %1011 = vmatprep.mubr.msk.bf16.mxu0 %vm1121_vm0, %v1120_v13  ;;  %v805_v51 = vld [vmem:[%s1396_s5] sm:$0xff]  ;;  %s831_s21 = sshll.u32 %s1124_s4, 4  ;;  %s832_s21 = int_to_ptr.vmem [resolvable:$true] %s831_s21 }
  0x46   :  { %s1096_s22 = scalar_lea.vmem %s832_s21, 128  ;;  %p1101_p1 = scmp.lt.s32.totalorder %s832_s21, %s832_s21 }
  0x47   :  { %p1097_p0 = scmp.ne.s32.totalorder %s832_s21, %s1096_s22  ;;  %p1102_p2 = scmp.lt.s32.totalorder %s1096_s22, %s1096_s22 }
  0x48   :  { %1010 = vmatpush3.bf16.msra.mxu0 %v1093_v14 }
  0x49   :  { %p1103_p3 = por %p1102_p2, %p1101_p1 }
  0x4b   :  { %p1104_p4 = pnand %p1103_p3, %p1097_p0 }
  0xf6   :  { %v932_v15 = vpop.f32.mrb[0].mxu0 }
  0xf7   :  { %v954_v16 = vpop.f32.mrb[0].mxu1  ;;  %v933_v18 = vpop.f32.mrb[1].mxu0 }
  0xf8   :  { %v955_v19 = vpop.f32.mrb[1].mxu1  ;;  %v934_v20 = vadd.f32 %v933_v18, %v932_v15  ;;  %v935_v22 = vpop.f32.mrb[2].mxu0 }
  0xf9   :  { %v956_v21 = vadd.f32 %v955_v19, %v954_v16  ;;  %v957_v23 = vpop.f32.mrb[2].mxu1  ;;  %v936_v24 = vpop.f32.mrb[3].mxu0 }
  0xfa   :  { %v958_v25 = vpop.f32.mrb[3].mxu1  ;;  %v611_v26 = vadd.f32 %v934_v20, %v839_v17 }
  0xfc   :  { %v651_v27 = vadd.f32 %v956_v21, %v611_v26 }
 0x116   :  { %v976_v28 = vpop.f32.mrb[4].mxu0 }
 0x117   :  { %v998_v29 = vpop.f32.mrb[4].mxu1  ;;  %v977_v30 = vpop.f32.mrb[5].mxu0 }
 0x118   :  { %v999_v31 = vpop.f32.mrb[5].mxu1  ;;  %v978_v32 = vadd.f32 %v977_v30, %v976_v28  ;;  %v979_v34 = vpop.f32.mrb[6].mxu0 }
 0x119   :  { %v1000_v33 = vadd.f32 %v999_v31, %v998_v29  ;;  %v1001_v35 = vpop.f32.mrb[6].mxu1  ;;  %v980_v36 = vpop.f32.mrb[7].mxu0 }
 0x11a   :  { %v1002_v37 = vpop.f32.mrb[7].mxu1  ;;  %v691_v38 = vadd.f32 %v978_v32, %v651_v27 }
 0x11c   :  { %v731_v39 = vadd.f32 %v1000_v33, %v691_v38 }
 0x11e   :  { %v736_v40 = vmax.f32 %v731_v39, 0.0 }
 0x120   :  { %v737_v41 = vpack.c.bf16 %v736_v40, %v736_v40 }
 0x122   :  { %1012 = vmatmul.mubr.msk.bf16.vlgmr.msra.gmra.mrb[8].mxu0 %vm761_vm1, %v737_v41 }
 0x1f5   :  { %v799_v43 = vpop.f32.mrb[8].mxu0 }
 0x1f6   :  { %v800_v44 = vadd.f32 %v912_v42, %v799_v43  ;;  %v1013_v45 = vpop.f32.mrb[9].mxu0 }
 0x1f7   :  { %v802_v46 = vpop.f32.mrb[10].mxu0 }
 0x1f8   :  { %v806_v47 = vmul.f32 0.5, %v800_v44  ;;  %v1014_v48 = vpop.f32.mrb[11].mxu0 }
 0x1fa   :  { %v807_v49 = vmul.f32 1.442695, %v806_v47 }
 0x1fc   :  { %1094 = vpow2.f32 %v807_v49 }
 0x206   :  { %v1095_v50 = vpop.eup %1094 }
 0x207   :  { %810 = vrot.lane.b32.xlu0 %v1095_v50, %s1122_s17 }
 0x20b   :  { %816 = vrot.lane.b32.xlu0 %v800_v44, %s1123_s18 }
 0x279   :  { %v811_v52 = vpop.permute.xlu0 %810 }
 0x27a   :  { %v813_v53 = vmul.f32 %v811_v52, %v805_v51 }
 0x27c   :  { %v814_v54 = vadd.f32 %v813_v53, %v800_v44 }
 0x27d   :  { %v817_v55 = vpop.permute.xlu0 %816 }
 0x27e   :  { %v820_v56 = vsel %vm819_vm2, %v814_v54, %v817_v55 }
 0x27f   :  { %v822_v57 = vsel %vm821_vm3, %v820_v56, %v817_v55 }
 0x280   :  { %824 = vst.msk [vmem:[#allocation2] sm:$0xff] %vm823_vm4, %v822_v57 }
 0x281   :  { %1107 = shalt.err (!%p1104_p4)
}
 0x282   :  { %s1108_s24 = scalar_lea.hbm %s1397_s6, 128 }
 0x283   :  { %p1109_p5 = scmp.ne.s32.totalorder %s1397_s6, %s1108_s24  ;;  %p1112_p6 = scmp.lt.u32.totalorder %s1108_s24, %s1397_s6 }
 0x285   :  { %p1114_p7 = pnand %p1112_p6, %p1109_p5 }
 0x287   :  { %1117 = shalt.err (!%p1114_p7)
}
 0x288   :  { %834 = dma.vmem_to_hbm [thread:$0]  %s832_s21, 128, %s1397_s6, [#allocation3]  }
 0x289   :  { %1118 = dma.done.wait [#allocation3], 128  }
 0x28a   :  { %1119 = vsyncadd [#allocation3], 4294967168 }
 0x28b   :  { %838 = vsyncpa [#allocation3], 1 }

</bundles_post_ra>
